<compile_context>
chip_gen: v6e
topology: v6e:2x2x1
jax: 0.10.0
libtpu: 0.0.40
codegen_flags: <defaults>
</compile_context>

<pallas_src>
import jax
import jax.numpy as jnp
from jax.experimental import pallas as pl
from jax.experimental.pallas import tpu as pltpu

HIDDEN = 128
FUSED = 2 * HIDDEN          # a-stream and v-stream side by side
LANE = 128                  # TPU lane width
MAX_TB = 1024               # batch-tile cap (step-overhead amortization)


def _round_up(x, m):
    return ((x + m - 1) // m) * m


def _dqn_kernel_fused(state_ref, w1_ref, b1_ref, w2_ref, b2_ref, w3_ref, b3_ref,
                      out_ref):
    """One batch tile: 3 fused matmuls; writes (a || v || 0-pad) as [TB, 128] bf16."""
    x = state_ref[...].astype(w1_ref.dtype)                        # f32 -> bf16 in-kernel

    h = jnp.dot(x, w1_ref[...], preferred_element_type=jnp.float32)
    h = jnp.maximum(h + b1_ref[...], 0.0)                          # [TB, 256] f32

    h = jnp.dot(h.astype(w2_ref.dtype), w2_ref[...],
                preferred_element_type=jnp.float32)
    h = jnp.maximum(h + b2_ref[...], 0.0)                          # [TB, 256] f32

    av = jnp.dot(h.astype(w3_ref.dtype), w3_ref[...],
                 preferred_element_type=jnp.float32) + b3_ref[...]  # [TB, 128] f32

    out_ref[...] = av.astype(out_ref.dtype)                        # bf16 writeback


def _dqn_kernel_split(state_ref, w1_ref, b1_ref, w2a_ref, w2v_ref, b2_ref,
                      w3_ref, b3_ref, out_ref):
    """v5e variant: layer 2 done as two 128x128 matmuls (skips the zero blocks)."""
    x = state_ref[...].astype(w1_ref.dtype)

    h = jnp.dot(x, w1_ref[...], preferred_element_type=jnp.float32)
    h = jnp.maximum(h + b1_ref[...], 0.0)                          # [TB, 256] f32
    hb = h.astype(w2a_ref.dtype)

    h2a = jnp.dot(hb[:, :HIDDEN], w2a_ref[...], preferred_element_type=jnp.float32)
    h2v = jnp.dot(hb[:, HIDDEN:], w2v_ref[...], preferred_element_type=jnp.float32)
    h2 = jnp.maximum(jnp.concatenate([h2a, h2v], axis=1) + b2_ref[...], 0.0)

    av = jnp.dot(h2.astype(w3_ref.dtype), w3_ref[...],
                 preferred_element_type=jnp.float32) + b3_ref[...]  # [TB, 128] f32

    out_ref[...] = av.astype(out_ref.dtype)


def _on_v5():
    try:
        kind = (getattr(jax.devices()[0], "device_kind", "") or "").lower()
        return "v5" in kind
    except Exception:  # pragma: no cover - CPU/interpret fallbacks
        return False


def pack_params(p, compute_dtype=jnp.bfloat16):
    """Host-side, one-time fusion of the a/v streams into the kernel weights."""
    S = p["w1a"].shape[0]
    A = p["w3a"].shape[1]
    out_pad = _round_up(A + 1, LANE)                  # lane-dense output width

    w1 = jnp.concatenate([p["w1a"], p["w1v"]], axis=1)            # [S, 256]
    b1 = jnp.concatenate([p["b1a"], p["b1v"]], axis=1)            # [1, 256]

    w2 = jnp.zeros((FUSED, FUSED), jnp.float32)                   # block-diagonal
    w2 = w2.at[:HIDDEN, :HIDDEN].set(p["w2a"])
    w2 = w2.at[HIDDEN:, HIDDEN:].set(p["w2v"])
    b2 = jnp.concatenate([p["b2a"], p["b2v"]], axis=1)            # [1, 256]

    w3 = jnp.zeros((FUSED, out_pad), jnp.float32)                 # [256, 128]
    w3 = w3.at[:HIDDEN, :A].set(p["w3a"])                         # a -> lanes 0..A-1
    w3 = w3.at[HIDDEN:, A:A + 1].set(p["w3v"])                    # v -> lane A
    b3 = jnp.zeros((1, out_pad), jnp.float32)
    b3 = b3.at[:, :A].set(p["b3a"])
    b3 = b3.at[:, A:A + 1].set(p["b3v"])

    return dict(
        w1=w1.astype(compute_dtype), b1=b1.astype(jnp.float32),
        w2=w2.astype(compute_dtype), b2=b2.astype(jnp.float32),
        w2a=p["w2a"].astype(compute_dtype),                       # v5e split path
        w2v=p["w2v"].astype(compute_dtype),
        w3=w3.astype(compute_dtype), b3=b3.astype(jnp.float32),
        state_size=S, action_size=A, out_pad=out_pad,
    )


def _pick_tiling(B, max_tb=MAX_TB, min_steps=2):
    """tb multiple of 8, <= max_tb, with >= min_steps grid steps and minimal pad."""
    n_steps = max(min_steps, -(-B // max_tb))
    tb = _round_up(-(-B // n_steps), 8)
    b_pad = n_steps * tb
    return tb, b_pad, n_steps


def dqn_forward(state, packed, *, split_layer2=None):
    """state: [B, S] float32 -> [B, A] float32, matching the PyTorch forward."""
    B, S = state.shape
    A = packed["action_size"]
    out_pad = packed["out_pad"]
    assert S == packed["state_size"]
    if split_layer2 is None:
        split_layer2 = _on_v5()

    tb, b_pad, n_steps = _pick_tiling(B)
    x = state
    if b_pad != B:
        x = jnp.pad(x, ((0, b_pad - B), (0, 0)))      # padded rows sliced off below

    def wspec(shape):
        return pl.BlockSpec(shape, lambda i: (0, 0))    # resident across grid steps

    if split_layer2:
        kernel = _dqn_kernel_split
        w_specs = [wspec((S, FUSED)), wspec((1, FUSED)),            # layer 1
                   wspec((HIDDEN, HIDDEN)), wspec((HIDDEN, HIDDEN)),  # layer 2 (split)
                   wspec((1, FUSED)),
                   wspec((FUSED, out_pad)), wspec((1, out_pad))]      # layer 3
        w_args = (packed["w1"], packed["b1"], packed["w2a"], packed["w2v"],
                  packed["b2"], packed["w3"], packed["b3"])
    else:
        kernel = _dqn_kernel_fused
        w_specs = [wspec((S, FUSED)), wspec((1, FUSED)),            # layer 1
                   wspec((FUSED, FUSED)), wspec((1, FUSED)),        # layer 2 (fused)
                   wspec((FUSED, out_pad)), wspec((1, out_pad))]    # layer 3
        w_args = (packed["w1"], packed["b1"], packed["w2"], packed["b2"],
                  packed["w3"], packed["b3"])

    av = pl.pallas_call(
        kernel,
        out_shape=jax.ShapeDtypeStruct((b_pad, out_pad), jnp.bfloat16),
        grid=(n_steps,),
        in_specs=[pl.BlockSpec((tb, S), lambda i: (i, 0))] + w_specs,
        out_specs=pl.BlockSpec((tb, out_pad), lambda i: (i, 0)),
        compiler_params=pltpu.CompilerParams(
            dimension_semantics=("parallel",)),          # dual-TC shard on v7x
    )(x, *w_args)

    a = av[:B, :A].astype(jnp.float32)            # [B, A]
    v = av[:B, A:A + 1].astype(jnp.float32)       # [B, 1]
    # GLOBAL scalar mean over all of `a` (matches torch's a.mean()); kept in f32 in
    # the XLA epilogue so it stays exact under the parallel / tiled batch grid.
    return v + a - jnp.mean(a)


def init_params(key, state_size, action_size):
    # NOTE: the original module zero-initializes all Linear layers (output would be
    # identically zero). We use deterministic small random weights instead so the
    # kernel computes something non-trivial; shapes match nn.Linear exactly.
    ks = jax.random.split(key, 12)

    def lin(kw, kb, fan_in, fan_out):
        w = jax.random.normal(kw, (fan_in, fan_out), jnp.float32) * 0.05
        b = jax.random.normal(kb, (1, fan_out), jnp.float32) * 0.05
        return w, b

    w1a, b1a = lin(ks[0], ks[1], state_size, HIDDEN)
    w2a, b2a = lin(ks[2], ks[3], HIDDEN, HIDDEN)
    w3a, b3a = lin(ks[4], ks[5], HIDDEN, action_size)
    w1v, b1v = lin(ks[6], ks[7], state_size, HIDDEN)
    w2v, b2v = lin(ks[8], ks[9], HIDDEN, HIDDEN)
    w3v, b3v = lin(ks[10], ks[11], HIDDEN, 1)
    return dict(w1a=w1a, b1a=b1a, w2a=w2a, b2a=b2a, w3a=w3a, b3a=b3a,
                w1v=w1v, b1v=b1v, w2v=w2v, b2v=b2v, w3v=w3v, b3v=b3v)


def dqn_forward_ref(state, p):
    """Pure-JAX f32 reference matching the PyTorch forward."""
    ha = jnp.maximum(state @ p["w1a"] + p["b1a"], 0.0)
    ha = jnp.maximum(ha @ p["w2a"] + p["b2a"], 0.0)
    a = ha @ p["w3a"] + p["b3a"]
    hv = jnp.maximum(state @ p["w1v"] + p["b1v"], 0.0)
    hv = jnp.maximum(hv @ p["w2v"] + p["b2v"], 0.0)
    v = hv @ p["w3v"] + p["b3v"]
    return v + a - jnp.mean(a)


if __name__ == "__main__":
    key = jax.random.PRNGKey(0)
    k_state, k_params = jax.random.split(key)

    batch, state_size, action_size = 8, 16, 4
    state = jax.random.normal(k_state, (batch, state_size), jnp.float32)
    params = init_params(k_params, state_size, action_size)
    packed = pack_params(params, compute_dtype=jnp.bfloat16)  # one-time host pack

    out = dqn_forward(state, packed)                 # auto-selects v5e split path
    out = jax.block_until_ready(out)

    ref = dqn_forward_ref(state, params)
    assert out.shape == (batch, action_size)
    # bf16 MXU operands + bf16 output slab (f32 accumulation / f32 mean epilogue):
    # tolerance loosened vs the pure-f32 reference.
    assert jnp.allclose(out, ref, atol=1e-2, rtol=1e-2), "mismatch vs reference"

    print("KERNEL_OK")
</pallas_src>

<mosaic_0001>
module attributes {stable_mosaic.version = 11 : i64} {
  func.func @_dqn_kernel_fused(%arg0: i32, %arg1: memref<8x16xf32, #tpu.memory_space<vmem>>, %arg2: memref<16x256xbf16, #tpu.memory_space<vmem>>, %arg3: memref<1x256xf32, #tpu.memory_space<vmem>>, %arg4: memref<256x256xbf16, #tpu.memory_space<vmem>>, %arg5: memref<1x256xf32, #tpu.memory_space<vmem>>, %arg6: memref<256x128xbf16, #tpu.memory_space<vmem>>, %arg7: memref<1x128xf32, #tpu.memory_space<vmem>>, %arg8: memref<8x128xbf16, #tpu.memory_space<vmem>>) attributes {dimension_semantics = [#tpu.dimension_semantics<parallel>], iteration_bounds = array<i64: 2>, scalar_prefetch = 0 : i64, scratch_operands = 0 : i64, tpu.core_type = #tpu.core_type<tc>, window_params = [{transform_indices = @transform_0, window_bounds = array<i64: 8, 16>}, {pipeline_mode = #tpu.pipeline_mode<synchronous>, transform_indices = @transform_1, window_bounds = array<i64: 16, 256>}, {pipeline_mode = #tpu.pipeline_mode<synchronous>, transform_indices = @transform_2, window_bounds = array<i64: 1, 256>}, {pipeline_mode = #tpu.pipeline_mode<synchronous>, transform_indices = @transform_3, window_bounds = array<i64: 256, 256>}, {pipeline_mode = #tpu.pipeline_mode<synchronous>, transform_indices = @transform_4, window_bounds = array<i64: 1, 256>}, {pipeline_mode = #tpu.pipeline_mode<synchronous>, transform_indices = @transform_5, window_bounds = array<i64: 256, 128>}, {pipeline_mode = #tpu.pipeline_mode<synchronous>, transform_indices = @transform_6, window_bounds = array<i64: 1, 128>}, {transform_indices = @transform_7, window_bounds = array<i64: 8, 128>}]} {
    %c0 = arith.constant 0 : index
    %c0_0 = arith.constant 0 : index
    %0 = vector.load %arg1[%c0, %c0_0] : memref<8x16xf32, #tpu.memory_space<vmem>>, vector<8x16xf32>
    %1 = arith.truncf %0 : vector<8x16xf32> to vector<8x16xbf16>
    %c0_1 = arith.constant 0 : index
    %c0_2 = arith.constant 0 : index
    %2 = vector.load %arg2[%c0_1, %c0_2] : memref<16x256xbf16, #tpu.memory_space<vmem>>, vector<16x256xbf16>
    %cst = arith.constant dense<0.000000e+00> : vector<8x256xf32>
    %3 = tpu.matmul %1, %2, %cst {dimension_numbers = #tpu.dot_dimension_numbers<[1], [0], [0], [1], [0, 0, 1, 1], [], []>} : vector<8x16xbf16>, vector<16x256xbf16>, vector<8x256xf32> -> vector<8x256xf32>
    %c0_3 = arith.constant 0 : index
    %c0_4 = arith.constant 0 : index
    %4 = vector.load %arg3[%c0_3, %c0_4] : memref<1x256xf32, #tpu.memory_space<vmem>>, vector<1x256xf32>
    %5 = vector.broadcast %4 : vector<1x256xf32> to vector<8x256xf32>
    %6 = arith.addf %3, %5 : vector<8x256xf32>
    %cst_5 = arith.constant 0.000000e+00 : f32
    %7 = vector.broadcast %cst_5 : f32 to vector<8x256xf32>
    %8 = arith.maximumf %6, %7 : vector<8x256xf32>
    %9 = arith.truncf %8 : vector<8x256xf32> to vector<8x256xbf16>
    %c0_6 = arith.constant 0 : index
    %c0_7 = arith.constant 0 : index
    %10 = vector.load %arg4[%c0_6, %c0_7] : memref<256x256xbf16, #tpu.memory_space<vmem>>, vector<256x256xbf16>
    %cst_8 = arith.constant dense<0.000000e+00> : vector<8x256xf32>
    %11 = tpu.matmul %9, %10, %cst_8 {dimension_numbers = #tpu.dot_dimension_numbers<[1], [0], [0], [1], [0, 0, 1, 1], [], []>} : vector<8x256xbf16>, vector<256x256xbf16>, vector<8x256xf32> -> vector<8x256xf32>
    %c0_9 = arith.constant 0 : index
    %c0_10 = arith.constant 0 : index
    %12 = vector.load %arg5[%c0_9, %c0_10] : memref<1x256xf32, #tpu.memory_space<vmem>>, vector<1x256xf32>
    %13 = vector.broadcast %12 : vector<1x256xf32> to vector<8x256xf32>
    %14 = arith.addf %11, %13 : vector<8x256xf32>
    %cst_11 = arith.constant 0.000000e+00 : f32
    %15 = vector.broadcast %cst_11 : f32 to vector<8x256xf32>
    %16 = arith.maximumf %14, %15 : vector<8x256xf32>
    %17 = arith.truncf %16 : vector<8x256xf32> to vector<8x256xbf16>
    %c0_12 = arith.constant 0 : index
    %c0_13 = arith.constant 0 : index
    %18 = vector.load %arg6[%c0_12, %c0_13] : memref<256x128xbf16, #tpu.memory_space<vmem>>, vector<256x128xbf16>
    %cst_14 = arith.constant dense<0.000000e+00> : vector<8x128xf32>
    %19 = tpu.matmul %17, %18, %cst_14 {dimension_numbers = #tpu.dot_dimension_numbers<[1], [0], [0], [1], [0, 0, 1, 1], [], []>} : vector<8x256xbf16>, vector<256x128xbf16>, vector<8x128xf32> -> vector<8x128xf32>
    %c0_15 = arith.constant 0 : index
    %c0_16 = arith.constant 0 : index
    %20 = vector.load %arg7[%c0_15, %c0_16] : memref<1x128xf32, #tpu.memory_space<vmem>>, vector<1x128xf32>
    %21 = vector.broadcast %20 : vector<1x128xf32> to vector<8x128xf32>
    %22 = arith.addf %19, %21 : vector<8x128xf32>
    %23 = arith.truncf %22 : vector<8x128xf32> to vector<8x128xbf16>
    %c0_17 = arith.constant 0 : index
    %c0_18 = arith.constant 0 : index
    %24 = vector.load %arg8[%c0_17, %c0_18] : memref<8x128xbf16, #tpu.memory_space<vmem>>, vector<8x128xbf16>
    tpu.vector_store %arg8[%c0_17, %c0_18], %23 {strides = array<i32>} : memref<8x128xbf16, #tpu.memory_space<vmem>>, vector<8x128xbf16>,
    return
  }
  func.func @transform_0(%arg0: i32) -> (i32, i32) {
    %c0_i32 = arith.constant 0 : i32
    %c0_i32_0 = arith.constant 0 : i32
    return %arg0, %c0_i32 : i32, i32
  }
  func.func @transform_1(%arg0: i32) -> (i32, i32) {
    %c0_i32 = arith.constant 0 : i32
    %c0_i32_0 = arith.constant 0 : i32
    %c0_i32_1 = arith.constant 0 : i32
    return %c0_i32, %c0_i32_0 : i32, i32
  }
  func.func @transform_2(%arg0: i32) -> (i32, i32) {
    %c0_i32 = arith.constant 0 : i32
    %c0_i32_0 = arith.constant 0 : i32
    %c0_i32_1 = arith.constant 0 : i32
    return %c0_i32, %c0_i32_0 : i32, i32
  }
  func.func @transform_3(%arg0: i32) -> (i32, i32) {
    %c0_i32 = arith.constant 0 : i32
    %c0_i32_0 = arith.constant 0 : i32
    %c0_i32_1 = arith.constant 0 : i32
    return %c0_i32, %c0_i32_0 : i32, i32
  }
  func.func @transform_4(%arg0: i32) -> (i32, i32) {
    %c0_i32 = arith.constant 0 : i32
    %c0_i32_0 = arith.constant 0 : i32
    %c0_i32_1 = arith.constant 0 : i32
    return %c0_i32, %c0_i32_0 : i32, i32
  }
  func.func @transform_5(%arg0: i32) -> (i32, i32) {
    %c0_i32 = arith.constant 0 : i32
    %c0_i32_0 = arith.constant 0 : i32
    %c0_i32_1 = arith.constant 0 : i32
    return %c0_i32, %c0_i32_0 : i32, i32
  }
  func.func @transform_6(%arg0: i32) -> (i32, i32) {
    %c0_i32 = arith.constant 0 : i32
    %c0_i32_0 = arith.constant 0 : i32
    %c0_i32_1 = arith.constant 0 : i32
    return %c0_i32, %c0_i32_0 : i32, i32
  }
  func.func @transform_7(%arg0: i32) -> (i32, i32) {
    %c0_i32 = arith.constant 0 : i32
    %c0_i32_0 = arith.constant 0 : i32
    return %arg0, %c0_i32 : i32, i32
  }
}

</mosaic_0001>

<bundles_post_ra>
// kernel: tpu_custom_call.1
= control target key start
LH: loop header
LB: loop body
LE: loop exit
PB: predicated region body
PF: predicated region fallthrough
CT: control target
= control target key end

     0   :  { %s1611_s0 = inlined_call_operand.hbm [shape: f32[16,16], index: 0, kind: input, shape index: {}]   ;;  %s1612_s1 = inlined_call_operand.hbm [shape: bf16[16,256], index: 1, kind: input, shape index: {}]   ;;  %s1613_s2 = inlined_call_operand.vmem [shape: f32[1,256], index: 2, kind: input, shape index: {}]   ;;  %s1614_s3 = inlined_call_operand.hbm [shape: bf16[256,256], index: 3, kind: input, shape index: {}]   ;;  %s1615_s4 = inlined_call_operand.vmem [shape: f32[1,256], index: 4, kind: input, shape index: {}]   ;;  %s1616_s5 = inlined_call_operand.hbm [shape: bf16[256,128], index: 5, kind: input, shape index: {}]   ;;  %s1617_s6 = inlined_call_operand.vmem [shape: f32[1,128], index: 6, kind: input, shape index: {}]   ;;  %s1618_s7 = inlined_call_operand.hbm [shape: bf16[16,128], index: 7, kind: output, shape index: {}]  }
   0x1   :  { %1623 = sst [smem:[#allocation15_spill]] %s1612_s1 }
   0x2   :  { %1624 = sst [smem:[#allocation16_spill]] %s1614_s3 }
   0x3   :  { %12 = vsyncpa [#allocation3], 0 }
   0x4   :  { %14 = vsyncpa [#allocation3 + $0x1], 0 }
   0x5   :  { %15 = vsyncpa [#allocation6], 0 }
   0x6   :  { %16 = vsyncpa [#allocation9], 0 }
   0x7   :  { %17 = vsyncpa [#allocation4], 0 }
   0x8   :  { %19 = vsyncpa [#allocation4 + $0x1], 0  ;;  %s1424_s24 = smov 0   ;;  %s1426_s25 = smov 0  }
   0x9   :  { %s1428_s26 = smov 0   ;;  %s1430_s27 = smov 0  }
   0xa LB: > { %s1445_s28 = sadd.s32 4294967295, %s1372_s27   ;;  %s953_s29 = sadd.s32 4294967294, %s1372_s27   ;;  %s1372_s27 = sphi %s1430_s27, %s1646_s27   ;;  %s1368_s26 = sphi %s1428_s26, %s1645_s26   ;;  %s1364_s25 = sphi %s1426_s25, %s1644_s25   ;;  %s1360_s24 = sphi %s1424_s24, %s1643_s24  }
   0xb   : > { %p45_p0 = scmp.ne.s32.totalorder %s1364_s25, %s1360_s24  ;;  %p1619_p1 = scmp.eq.s32.totalorder %s1445_s28, 0 }
   0xc   : > { %p201_p3 = scmp.eq.s32.totalorder %s953_s29, 1  ;;  %p954_p5 = scmp.ge.s32.totalorder %s1372_s27, 1 }
   0xd   : > { %p1454_p4 = por %p1619_p1, %p45_p0  ;;  %p208_p7 = scmp.lt.s32.totalorder %s1372_s27, 3 }
   0xe   : > { %p1459_p6 = por %p201_p3, %p45_p0  ;;  %s1374_s10 = smov [#allocation5]  }
   0xf   : > { %s1625_s30 = scalar_select %p1454_p4, 1, 0 }
  0x10   : > { %s1626_s8 = scalar_select %p1459_p6, 1, 0 }
  0x11   : > { %p1464_p8 = pnand %p954_p5, %p208_p7  ;;  %s220_s11 = sshll.u32 %s1374_s10, 4  ;;  %s221_s11 = int_to_ptr.vmem [resolvable:$true] %s220_s11 }
  0x12   : > { %s1375_s13 = smov [#allocation7]   ;;  %s1376_s15 = smov [#allocation8]  }
  0x13   : > { %s1627_s9 = scalar_select %p1464_p8, 1, 0 }
  0x14   : > { %p1061_p9 = pneg %p1464_p8  ;;  %s236_s14 = sshll.u32 %s1375_s13, 4  ;;  %s237_s14 = int_to_ptr.vmem [resolvable:$true] %s236_s14 }
  0x15   : > { %s252_s16 = sshll.u32 %s1376_s15, 4  ;;  %s1205_s17 = scalar_lea.vmem %s221_s11, 256  ;;  %s253_s16 = int_to_ptr.vmem [resolvable:$true] %s252_s16 }
  0x16   : > { %p1473_p11 = pnand %p1061_p9, %p1619_p1  ;;  %p1206_p13 = scmp.ne.s32.totalorder %s221_s11, %s1205_s17 }
  0x17   : > { %p1213_p5 = scmp.lt.s32.totalorder %s221_s11, %s221_s11  ;;  %p1214_p7 = scmp.lt.s32.totalorder %s1205_s17, %s1205_s17 }
  0x18   : > { %p1196_p12 = pneg %p1473_p11 }
  0x19   : > { %p1215_p9 = por %p1214_p7, %p1213_p5 }
  0x1a   : > { %p1208_p0 = pnand %p1206_p13, %p1196_p12 }
  0x1c   : > { %p1209_p3 = pneg %p1208_p0 }
  0x1e   : > { %p1216_p10 = pnand %p1215_p9, %p1209_p3 }
  0x20   : > { %1219 = shalt.err (!%p1216_p10)
}
  0x21   : > { %s1377_s18 = smov 128   ;;  %s1378_s19 = smov 8  }
  0x22   : > { %s1629_s1 = sld [smem:[#allocation15_spill]]  ;;  %s1231_s22 = scalar_lea.vmem %s237_s14, 4096 }
  0x23   : > { %p1232_p1 = scmp.ne.s32.totalorder %s237_s14, %s1231_s22  ;;  %p1239_p2 = scmp.lt.s32.totalorder %s237_s14, %s237_s14 }
  0x24   : > { %p1240_p6 = scmp.lt.s32.totalorder %s1231_s22, %s1231_s22 }
  0x25   : > { %p1234_p13 = pnand %p1232_p1, %p1196_p12 }
  0x26   : > { %p1241_p5 = por %p1240_p6, %p1239_p2 }
  0x27   : > { %p1235_p0 = pneg %p1234_p13 }
  0x28   : > { %1064 = dma.hbm_to_vmem [thread:$0]  (!%p1473_p11), %s1629_s1, 256, %s221_s11, [#allocation6], %s1377_s18, %s1377_s18, %s1378_s19  }
  0x29   : > { %p1242_p3 = pnand %p1241_p5, %p1235_p0 }
  0x2b   : > { %1245 = shalt.err (!%p1242_p3)
}
  0x2c   : > { %s1630_s3 = sld [smem:[#allocation16_spill]]  ;;  %s1257_s10 = scalar_lea.vmem %s253_s16, 2048 }
  0x2d   : > { %p1258_p10 = scmp.ne.s32.totalorder %s253_s16, %s1257_s10  ;;  %p1265_p9 = scmp.lt.s32.totalorder %s253_s16, %s253_s16 }
  0x2e   : > { %p1266_p13 = scmp.lt.s32.totalorder %s1257_s10, %s1257_s10 }
  0x2f   : > { %p1260_p7 = pnand %p1258_p10, %p1196_p12 }
  0x30   : > { %p1267_p4 = por %p1266_p13, %p1265_p9 }
  0x31   : > { %p1261_p1 = pneg %p1260_p7 }
  0x32   : > { %1067 = dma.hbm_to_vmem [thread:$0]  (!%p1473_p11), %s1630_s3, 4096, %s237_s14, [#allocation6], %s1377_s18, %s1377_s18, %s1378_s19  }
  0x33   : > { %p1268_p2 = pnand %p1267_p4, %p1261_p1 }
  0x35   : > { %1271 = shalt.err (!%p1268_p2)
}
  0x36   : > { %s1379_s11 = smov 64   ;;  %s1380_s13 = smov 4  }
  0x37   : > { %1070 = dma.hbm_to_vmem [thread:$0]  (!%p1473_p11), %s1616_s5, 2048, %s253_s16, [#allocation9], %s1379_s11, %s1379_s11, %s1380_s13  }
  0x38   : > { %s1504_s17 = sadd.s32 1, %s1372_s27   ;;  %s32_s19 = sadd.s32 1, %s1368_s26 }
  0x39   : > { %s29_s18 = ssub.s32 %s1372_s27, %s1504_s17  ;;  %p39_p6 = scmp.ne.s32.totalorder %s1368_s26, %s1364_s25 }
  0x3a   : > { %p30_p4 = scmp.eq.s32.totalorder %s29_s18, 0  ;;  %p40_p12 = scmp.eq.s32.totalorder %s1372_s27, 0 }
  0x3b   : > { %p1082_p0 = scmp.lt.s32.totalorder %s1372_s27, 2  ;;  %p1631_p3 = scmp.eq.s32.totalorder %s1445_s28, 1 }
  0x3c   : > { %s1514_s20 = scalar_select %p30_p4, %s1368_s26, %s32_s19  }
  0x3d   : > { %p41_p5 = por %p40_p12, %p39_p6  ;;  %p1518_p10 = por %p1631_p3, %p39_p6 }
  0x3e   : > { %s269_s12 = sand.u32 1, %s1368_s26   ;;  %s960_s22 = sshll.u32 %s1372_s27, 7 }
  0x3f   : > { %s1632_s21 = scalar_select %p1518_p10, 1, 0 }
  0x40   : > { %s959_s16 = sshll.u32 %s269_s12, 3  ;;  %s1527_s10 = scalar_lea.hbm %s1611_s0, %s960_s22 }
  0x41   : > { %s273_s11 = scalar_lea.vmem [#allocation2], %s959_s16  ;;  %p1529_p11 = pnand %p1082_p0, %p41_p5 }
  0x42   : > { %s280_s13 = sshll.u32 %s273_s11, 4  ;;  %s270_s15 = scalar_lea.sflag [#allocation3], %s269_s12  ;;  %s281_s13 = int_to_ptr.vmem [resolvable:$true] %s280_s13 }
  0x43   : > { %s1272_s18 = scalar_lea.hbm %s1527_s10, 128  ;;  %p1274_p1 = pneg %p1529_p11 }
  0x44   : > { %p1273_p7 = scmp.ne.s32.totalorder %s1527_s10, %s1272_s18  ;;  %s1277_s23 = scalar_lea.hbm %s1611_s0, 256 }
  0x45   : > { %p1278_p2 = scmp.lt.s32.totalorder %s1527_s10, %s1611_s0  ;;  %p1279_p4 = scmp.lt.s32.totalorder %s1277_s23, %s1272_s18 }
  0x46   : > { %p1275_p9 = pnand %p1274_p1, %p1273_p7 }
  0x47   : > { %p1280_p6 = por %p1279_p4, %p1278_p2 }
  0x48   : > { %p1276_p13 = pneg %p1275_p9 }
  0x4a   : > { %p1281_p12 = pnand %p1280_p6, %p1276_p13 }
  0x4c   : > { %1284 = shalt.err (!%p1281_p12)
}
  0x4d   : > { %s1285_s11 = scalar_lea.vmem %s281_s13, 128  ;;  %s1381_s12 = smov [#allocation2]  }
  0x4e   : > { %p1286_p0 = scmp.ne.s32.totalorder %s281_s13, %s1285_s11  ;;  %s1290_s1 = sshll.u32 %s1381_s12, 4  ;;  %s1291_s1 = int_to_ptr.vmem [resolvable:$false] %s1290_s1 }
  0x4f   : > { %s1292_s3 = scalar_lea.vmem %s1291_s1, 256  ;;  %p1293_p7 = scmp.lt.s32.totalorder %s281_s13, %s1291_s1 }
  0x50   : > { %p1288_p5 = pnand %p1286_p0, %p1274_p1  ;;  %p1294_p9 = scmp.lt.s32.totalorder %s1292_s3, %s1285_s11 }
  0x52   : > { %p1289_p3 = pneg %p1288_p5  ;;  %p1295_p10 = por %p1294_p9, %p1293_p7 }
  0x54   : > { %p1296_p8 = pnand %p1295_p10, %p1289_p3 }
  0x56   : > { %1299 = shalt.err (!%p1296_p8)
}
  0x57   : > { %1074 = dma.hbm_to_vmem [thread:$0]  (!%p1529_p11), %s1527_s10, 128, %s281_s13, %s270_s15  }
  0x58   : > { %p1634_p13 = scmp.ne.s32.totalorder %s1627_s9, 0 }
  0x59   : > { %s1550_s18 = sand.u32 (!%p1634_p13), 1, %s1364_s25   ;;  %p1635_p1 = scmp.ne.s32.totalorder (!%p1634_p13), %s1625_s30, 0 }
  0x5a   : > { %289 = sbr.rel (%p1634_p13) target bundleno = 725 (0x2d5), region = 48  ;;  %s962_s19 = sshll.u32 (!%p1634_p13), %s1550_s18, 3 }
  0x5b   : > { %s292_s22 = scalar_lea.sflag (!%p1634_p13), [#allocation3], %s1550_s18  ;;  %s295_s1 = scalar_lea.vmem (!%p1634_p13), [#allocation2], %s962_s19 }
  0x5f   : > { %1343 = dma.done.wait (%p1635_p1), %s292_s22, 128  }
  0x60   : > { %1345 = vsyncadd (%p1635_p1), %s292_s22, 4294967168  ;;  %p1636_p8 = scmp.eq.s32.totalorder %s1445_s28, 0 }
  0x62   : > { %1347 = dma.done.wait (%p1636_p8), [#allocation6], 4352   ;;  %p1637_p10 = pmov %p1636_p8 }
  0x63   : > { %p1638_p11 = pmov %p1636_p8 }
  0x64   : > { %1349 = vsyncadd (%p1637_p10), [#allocation6], 4294962944 }
  0x65   : > { %1351 = dma.done.wait (%p1638_p11), [#allocation9], 2048   ;;  %p1639_p2 = pmov %p1636_p8 }
  0x66   : > { %v1382_v0 = vmov 0   ;;  %v1127_v1 = vld [vmem:[#allocation5 + $0x4] ss:$8 sps:$4 sm:$0xff]   ;;  %v1129_v2 = vld [vmem:[#allocation5] ss:$8 sps:$4 sm:$0xff]   ;;  %v339_v3 = vld [vmem:[%s295_s1] sm:$0xff]  ;;  %v345_v49 = vlaneseq }
  0x67   : > { %1353 = vsyncadd (%p1639_p2), [#allocation9], 4294965248  ;;  %401 = vmatprep.mubr.bf16.mxu0 %v1382_v0  ;;  %383 = vmatprep.subr.bf16.mxu0 %v1127_v1  ;;  %v340_v4 = vpack.c.bf16 %v339_v3, %v339_v3  ;;  %v1130_v5 = vld [vmem:[#allocation7 + $0x74] ss:$8 sps:$4 sm:$0xff]   ;;  %v1132_v6 = vld [vmem:[#allocation7 + $0x70] ss:$8 sps:$4 sm:$0xff]  }
  0x68   : > { %384 = vmatpush1.bf16.msra.mxu0 %v1129_v2  ;;  %vm365_vm0 = vcmask 130048   ;;  %v1133_v7 = vld [vmem:[#allocation7 + $0x64] ss:$8 sps:$4 sm:$0xff]   ;;  %618 = vmatprep.subr.bf16.mxu1 %v1130_v5  ;;  %v1135_v8 = vld [vmem:[#allocation7 + $0x60] ss:$8 sps:$4 sm:$0xff]   ;;  %v1178_v37 = vld [vmem:[#allocation8 + $0x78] sm:$0xff]  }
  0x69   : > { %619 = vmatpush1.bf16.msra.mxu1 %v1132_v6  ;;  %v1136_v9 = vld [vmem:[#allocation7 + $0x54] ss:$8 sps:$4 sm:$0xff]   ;;  %v1138_v10 = vld [vmem:[#allocation7 + $0x50] ss:$8 sps:$4 sm:$0xff]   ;;  %v1139_v11 = vld [vmem:[#allocation7 + $0x44] ss:$8 sps:$4 sm:$0xff]   ;;  %1023 = vmatprep.subr.bf16.mxu0 %v1178_v37 }
  0x6a   : > { %620 = vmatprep.subr.bf16.mxu1 %v1133_v7  ;;  %v1141_v12 = vld [vmem:[#allocation7 + $0x40] ss:$8 sps:$4 sm:$0xff]   ;;  %v1142_v13 = vld [vmem:[#allocation7 + $0x34] ss:$8 sps:$4 sm:$0xff]   ;;  %v1144_v14 = vld [vmem:[#allocation7 + $0x30] ss:$8 sps:$4 sm:$0xff]  }
  0x6b   : > { %969 = vmatmul.mubr.msk.bf16.vlgmr.msra.gmra.mxu0 %vm365_vm0, %v340_v4  ;;  %v1145_v15 = vld [vmem:[#allocation7 + $0x24] ss:$8 sps:$4 sm:$0xff]   ;;  %v1147_v16 = vld [vmem:[#allocation7 + $0x20] ss:$8 sps:$4 sm:$0xff]   ;;  %v1148_v17 = vld [vmem:[#allocation7 + $0x14] ss:$8 sps:$4 sm:$0xff]  }
  0x6c   : > { %v1150_v18 = vld [vmem:[#allocation7 + $0x10] ss:$8 sps:$4 sm:$0xff]   ;;  %v1151_v19 = vld [vmem:[#allocation7 + $0x4] ss:$8 sps:$4 sm:$0xff]   ;;  %v1153_v20 = vld [vmem:[#allocation7] ss:$8 sps:$4 sm:$0xff]  }
  0x6d   : > { %621 = vmatpush1.bf16.msra.mxu1 %v1135_v8  ;;  %v1154_v21 = vld [vmem:[#allocation7 + $0xf4] ss:$8 sps:$4 sm:$0xff]   ;;  %v1156_v22 = vld [vmem:[#allocation7 + $0xf0] ss:$8 sps:$4 sm:$0xff]   ;;  %v1157_v23 = vld [vmem:[#allocation7 + $0xe4] ss:$8 sps:$4 sm:$0xff]  }
  0x6e   : > { %622 = vmatprep.subr.bf16.mxu1 %v1136_v9  ;;  %v1159_v24 = vld [vmem:[#allocation7 + $0xe0] ss:$8 sps:$4 sm:$0xff]   ;;  %v1160_v25 = vld [vmem:[#allocation7 + $0xd4] ss:$8 sps:$4 sm:$0xff]   ;;  %v1162_v26 = vld [vmem:[#allocation7 + $0xd0] ss:$8 sps:$4 sm:$0xff]  }
  0x6f   : > { %v1163_v27 = vld [vmem:[#allocation7 + $0xc4] ss:$8 sps:$4 sm:$0xff]   ;;  %v1165_v28 = vld [vmem:[#allocation7 + $0xc0] ss:$8 sps:$4 sm:$0xff]   ;;  %v1166_v29 = vld [vmem:[#allocation7 + $0xb4] ss:$8 sps:$4 sm:$0xff]  }
  0x70   : > { %v1168_v30 = vld [vmem:[#allocation7 + $0xb0] ss:$8 sps:$4 sm:$0xff]   ;;  %v1169_v31 = vld [vmem:[#allocation7 + $0xa4] ss:$8 sps:$4 sm:$0xff]   ;;  %v1171_v32 = vld [vmem:[#allocation7 + $0xa0] ss:$8 sps:$4 sm:$0xff]  }
  0x71   : > { %623 = vmatpush1.bf16.msra.mxu1 %v1138_v10  ;;  %v1172_v33 = vld [vmem:[#allocation7 + $0x94] ss:$8 sps:$4 sm:$0xff]   ;;  %v1174_v34 = vld [vmem:[#allocation7 + $0x90] ss:$8 sps:$4 sm:$0xff]   ;;  %v1175_v35 = vld [vmem:[#allocation7 + $0x84] ss:$8 sps:$4 sm:$0xff]  }
  0x72   : > { %624 = vmatprep.subr.bf16.mxu1 %v1139_v11  ;;  %v1177_v36 = vld [vmem:[#allocation7 + $0x80] ss:$8 sps:$4 sm:$0xff]   ;;  %v1179_v38 = vld [vmem:[#allocation8 + $0x38] sm:$0xff]   ;;  %v1180_v39 = vld [vmem:[#allocation8 + $0x70] sm:$0xff]   ;;  %v346_v50 = vshrl.u32 %v345_v49, 7  ;;  %s966_s13 = sshll.u32 %s1550_s18, 2 }
  0x73   : > { %1024 = vmatpush3.bf16.msra.mxu0 %v1179_v38  ;;  %v1181_v40 = vld [vmem:[#allocation8 + $0x30] sm:$0xff]   ;;  %v1182_v41 = vld [vmem:[#allocation8 + $0x68] sm:$0xff]   ;;  %v1184_v43 = vld [vmem:[#allocation8 + $0x60] sm:$0xff]   ;;  %s1020_s23 = sshll.u32 %s1445_s28, 6  ;;  %s337_s29 = scalar_lea.vmem [#allocation10], %s966_s13 }
  0x74   : > { %1025 = vmatprep.subr.bf16.mxu0 %v1180_v39  ;;  %v1183_v42 = vld [vmem:[#allocation8 + $0x28] sm:$0xff]   ;;  %v1185_v44 = vld [vmem:[#allocation8 + $0x20] sm:$0xff]   ;;  %v1186_v45 = vld [vmem:[#allocation8 + $0x58] sm:$0xff]   ;;  %v347_v51 = vsub.s32 0, %v346_v50  ;;  %v351_v53 = vsub.s32 1, %v346_v50  ;;  %s854_s16 = sshll.u32 %s337_s29, 4  ;;  %s852_s19 = scalar_lea.hbm %s1618_s7, %s1020_s23  ;;  %s855_s16 = int_to_ptr.vmem [resolvable:$true] %s854_s16 }
  0x75   : > { %625 = vmatpush1.bf16.msra.mxu1 %v1141_v12  ;;  %v1187_v46 = vld [vmem:[#allocation8 + $0x18] sm:$0xff]   ;;  %v1188_v47 = vld [vmem:[#allocation8 + $0x50] sm:$0xff]   ;;  %v343_v52 = vld [vmem:[%s1613_s2] sm:$0x3]  ;;  %s841_s22 = scalar_lea.sflag [#allocation4], %s1550_s18  ;;  %s1300_s1 = scalar_lea.vmem %s855_s16, 64 }
  0x76   : > { %626 = vmatprep.subr.bf16.mxu1 %v1142_v13  ;;  %v1189_v48 = vld [vmem:[#allocation8 + $0x10] sm:$0xff]   ;;  %v348_v54 = vrot.slane %v343_v52, %v347_v51  ;;  %v352_v55 = vrot.slane %v343_v52, %v351_v53  ;;  %v1190_v2 = vld [vmem:[#allocation8 + $0x48] sm:$0xff]   ;;  %v1192_v4 = vld [vmem:[#allocation8 + $0x40] sm:$0xff]   ;;  %p1301_p4 = scmp.ne.s32.totalorder %s855_s16, %s1300_s1  ;;  %p1640_p6 = scmp.ne.s32.totalorder %s1632_s21, 0 }
  0x77   : > { %1026 = vmatpush3.bf16.msra.mxu0 %v1181_v40  ;;  %v1191_v3 = vld [vmem:[#allocation8 + $0x8] sm:$0xff]   ;;  %v1193_v5 = vld [vmem:[#allocation8] sm:$0xff]   ;;  %s1383_s3 = smov [#allocation10]  }
  0x78   : > { %1027 = vmatprep.subr.bf16.mxu0 %v1182_v41  ;;  %v446_v6 = vld [vmem:[%s1615_s4] sm:$0x3]  ;;  %p1302_p12 = pnand %p1301_p4, %p1640_p6  ;;  %s1304_s30 = sshll.u32 %s1383_s3, 4  ;;  %s1305_s30 = int_to_ptr.vmem [resolvable:$false] %s1304_s30 }
  0x79   : > { %627 = vmatpush1.bf16.msra.mxu1 %v1144_v14  ;;  %v451_v7 = vrot.slane %v446_v6, %v347_v51  ;;  %v455_v8 = vrot.slane %v446_v6, %v351_v53  ;;  %s1306_s28 = scalar_lea.vmem %s1305_s30, 128  ;;  %p1307_p5 = scmp.lt.s32.totalorder %s855_s16, %s1305_s30 }
  0x7a   : > { %628 = vmatprep.subr.bf16.mxu1 %v1145_v15  ;;  %p1303_p0 = pneg %p1302_p12  ;;  %p1308_p3 = scmp.lt.s32.totalorder %s1306_s28, %s1300_s1 }
  0x7b   : > { %1028 = vmatpush3.bf16.msra.mxu0 %v1183_v42 }
  0x7c   : > { %1029 = vmatprep.subr.bf16.mxu0 %v1184_v43  ;;  %p1309_p7 = por %p1308_p3, %p1307_p5 }
  0x7d   : > { %629 = vmatpush1.bf16.msra.mxu1 %v1147_v16 }
  0x7e   : > { %630 = vmatprep.subr.bf16.mxu1 %v1148_v17  ;;  %p1310_p9 = pnand %p1309_p7, %p1303_p0 }
  0x7f   : > { %1030 = vmatpush3.bf16.msra.mxu0 %v1185_v44 }
  0x80   : > { %1031 = vmatprep.subr.bf16.mxu0 %v1186_v45 }
  0x81   : > { %631 = vmatpush1.bf16.msra.mxu1 %v1150_v18 }
  0x82   : > { %632 = vmatprep.subr.bf16.mxu1 %v1151_v19 }
  0x83   : > { %1032 = vmatpush3.bf16.msra.mxu0 %v1187_v46 }
  0x84   : > { %1033 = vmatprep.subr.bf16.mxu0 %v1188_v47 }
  0x85   : > { %633 = vmatpush1.bf16.msra.mxu1 %v1153_v20  ;;  %v1002_v20 = vld [vmem:[%s1617_s6] ss:$0 sm:$0xff] }
  0x86   : > { %634 = vmatprep.subr.bf16.mxu1 %v1154_v21 }
  0x87   : > { %1034 = vmatpush3.bf16.msra.mxu0 %v1189_v48 }
  0x88   : > { %1035 = vmatprep.subr.bf16.mxu0 %v1190_v2 }
  0x89   : > { %635 = vmatpush2.bf16.msra.mxu1 %v1156_v22 }
  0x8a   : > { %636 = vmatprep.subr.bf16.mxu1 %v1157_v23 }
  0x8b   : > { %1036 = vmatpush3.bf16.msra.mxu0 %v1191_v3 }
  0x8c   : > { %1037 = vmatprep.subr.bf16.mxu0 %v1192_v4 }
  0x8d   : > { %637 = vmatpush2.bf16.msra.mxu1 %v1159_v24 }
  0x8e   : > { %638 = vmatprep.subr.bf16.mxu1 %v1160_v25 }
  0x8f   : > { %1038 = vmatpush3.bf16.msra.mxu0 %v1193_v5 }
  0x91   : > { %639 = vmatpush2.bf16.msra.mxu1 %v1162_v26 }
  0x92   : > { %640 = vmatprep.subr.bf16.mxu1 %v1163_v27 }
  0x95   : > { %641 = vmatpush2.bf16.msra.mxu1 %v1165_v28 }
  0x96   : > { %642 = vmatprep.subr.bf16.mxu1 %v1166_v29 }
  0x99   : > { %643 = vmatpush2.bf16.msra.mxu1 %v1168_v30 }
  0x9a   : > { %644 = vmatprep.subr.bf16.mxu1 %v1169_v31 }
  0x9d   : > { %645 = vmatpush2.bf16.msra.mxu1 %v1171_v32 }
  0x9e   : > { %646 = vmatprep.subr.bf16.mxu1 %v1172_v33 }
  0xa1   : > { %647 = vmatpush2.bf16.msra.mxu1 %v1174_v34 }
  0xa2   : > { %648 = vmatprep.subr.bf16.mxu1 %v1175_v35 }
  0xa5   : > { %649 = vmatpush2.bf16.msra.mxu1 %v1177_v36 }
 0x12b   : > { %v403_v56 = vpop.f32.mrf.mxu0 }
 0x12c   : > { %v404_v57 = vadd.f32 %v403_v56, %v348_v54 }
 0x12d   : > { %v405_v58 = vpop.f32.mrf.mxu0 }
 0x12e   : > { %v406_v59 = vadd.f32 %v405_v58, %v352_v55  ;;  %v410_v60 = vmax.f32 %v404_v57, 0.0 }
 0x12f   : > { %v407_v61 = vpop.f32.mrf.mxu0 }
 0x130   : > { %v411_v62 = vmax.f32 %v406_v59, 0.0  ;;  %v412_v1 = vpack.c.bf16 %v410_v60, %v410_v60 }
 0x131   : > { %v408_v63 = vpop.f32.mrf.mxu0 }
 0x132   : > { %v413_v0 = vpack.c.bf16 %v411_v62, %v411_v62 }
 0x134   : > { %650 = vmatprep.mubr.bf16.mxu1 %v413_v0 }
 0x135   : > { %651 = vmatmul.mubr.bf16.vlgmr.msra.gmra.mxu1 %v412_v1 }
 0x1f5   : > { %v652_v9 = vpop.f32.mrf.mxu1 }
 0x1f6   : > { %v653_v10 = vadd.f32 %v652_v9, %v451_v7 }
 0x1f7   : > { %v654_v11 = vpop.f32.mrf.mxu1 }
 0x1f8   : > { %v655_v12 = vadd.f32 %v654_v11, %v455_v8  ;;  %v659_v13 = vmax.f32 %v653_v10, 0.0 }
 0x1f9   : > { %v656_v14 = vpop.f32.mrf.mxu1 }
 0x1fa   : > { %v660_v15 = vmax.f32 %v655_v12, 0.0  ;;  %v661_v18 = vpack.c.bf16 %v659_v13, %v659_v13 }
 0x1fb   : > { %v657_v16 = vpop.f32.mrf.mxu1 }
 0x1fc   : > { %v662_v17 = vpack.c.bf16 %v660_v15, %v660_v15 }
 0x1fe   : > { %830 = vmatprep.mubr.bf16.mxu0 %v662_v17 }
 0x1ff   : > { %831 = vmatmul.mubr.bf16.vlgmr.msra.gmra.mxu0 %v661_v18 }
 0x2bf   : > { %v1039_v19 = vpop.f32.mrf.mxu0 }
 0x2c1   : > { %v1040_v21 = vpop.f32.mrf.mxu0 }
 0x2c2   : > { %v1041_v22 = vadd.f32 %v1040_v21, %v1039_v19 }
 0x2c3   : > { %v1042_v23 = vpop.f32.mrf.mxu0 }
 0x2c4   : > { %v833_v24 = vadd.f32 %v1041_v22, %v1002_v20 }
 0x2c5   : > { %v1043_v25 = vpop.f32.mrf.mxu0 }
 0x2c6   : > { %v838_v26 = vpack.c.bf16 %v833_v24, %v833_v24 }
 0x2c8   : > { %839 = vst [vmem:[%s337_s29] sm:$0xf] %v838_v26 }
 0x2c9   : > { %1313 = shalt.err (!%p1310_p9)
}
 0x2ca   : > { %s1314_s9 = scalar_lea.hbm %s852_s19, 64  ;;  %s1318_s13 = scalar_lea.hbm %s1618_s7, 128 }
 0x2cb   : > { %p1315_p13 = scmp.ne.s32.totalorder %s852_s19, %s1314_s9  ;;  %p1319_p10 = scmp.lt.s32.totalorder %s852_s19, %s1618_s7 }
 0x2cc   : > { %p1320_p11 = scmp.lt.s32.totalorder %s1318_s13, %s1314_s9 }
 0x2cd   : > { %p1316_p1 = pnand %p1315_p13, %p1640_p6 }
 0x2ce   : > { %p1321_p2 = por %p1320_p11, %p1319_p10 }
 0x2cf   : > { %p1317_p8 = pneg %p1316_p1 }
 0x2d1   : > { %p1322_p4 = pnand %p1321_p2, %p1317_p8 }
 0x2d3   : > { %1325 = shalt.err (!%p1322_p4)
}
 0x2d4   : > { %1059 = dma.vmem_to_hbm [thread:$0]  (%p1640_p6), %s855_s16, 64, %s852_s19, %s841_s22  }
 0x2d5 PF: > { %s866_s23 = sand.u32 1, %s1360_s24   ;;  %p1641_p12 = scmp.ne.s32.totalorder %s1626_s8, 0 }
 0x2d6   : > { %p1642_p0 = scmp.ge.s32.totalorder %s1372_s27, 2  ;;  %s867_s29 = scalar_lea.sflag [#allocation4], %s866_s23 }
 0x2d8   : > { %p1076_p5 = pnand %p1642_p0, %p1641_p12 }
 0x2da   : > { %p1077_p3 = pneg %p1076_p5 }
 0x2dc   : > { %1355 = dma.done.wait (%p1077_p3), %s867_s29, 64  }
 0x2dd   : > { %1357 = vsyncadd (%p1077_p3), %s867_s29, 4294967232  ;;  %p22_p7 = scmp.ge.s32.totalorder %s1504_s17, 4   ;;  %s1643_s24 = smov %s1364_s25 }
 0x2de   : > { %s1644_s25 = smov %s1368_s26  ;;  %s1645_s26 = smov %s1514_s20 }
 0x2df   : > { %s1646_s27 = smov %s1504_s17  ;;  %24 = sbr.rel (!%p22_p7) target bundleno = 10 (0xa), region = 105 }
 0x2e4   :  { %872 = vsyncpa [#allocation3], 1 }
 0x2e5   :  { %874 = vsyncpa [#allocation3 + $0x1], 1 }
 0x2e6   :  { %875 = vsyncpa [#allocation6], 1 }
 0x2e7   :  { %876 = vsyncpa [#allocation9], 1 }
 0x2e8   :  { %877 = vsyncpa [#allocation4], 1 }
 0x2e9   :  { %879 = vsyncpa [#allocation4 + $0x1], 1 }

</bundles_post_ra>
